<compile_context>
chip_gen: v7x
topology: tpu7x:2x2x1
jax: 0.10.0
libtpu: 0.0.40
codegen_flags: <defaults>
</compile_context>

<pallas_src>
import math
import functools

import jax
import jax.numpy as jnp
from jax import lax
from jax.experimental import pallas as pl
from jax.experimental.pallas import tpu as pltpu


def _pos_enc_kernel(seed_ref, x_ref, pe_ref, o_ref, *,
                    batch, d_model, n_cols, tile_rows,
                    p, training, use_hw_prng):
    """x_ref: (TS, B*D), pe_ref: (TS, D), o_ref: (TS, B*D)."""
    pe = pe_ref[...]                                       # (TS, D), x dtype
    do_dropout = training and p > 0.0

    if do_dropout:
        inv_keep = jnp.asarray(1.0 / (1.0 - p), dtype=pe.dtype)
        # Integer threshold: P(bits < threshold) = p, no float conversion of bits.
        threshold = jnp.uint32(min(int(round(p * 4294967296.0)), 4294967295))
        if use_hw_prng:
            # Decorrelate streams across grid tiles by seeding with (seed, tile).
            pltpu.prng_seed(seed_ref[0], pl.program_id(0))

    # Loop over D-wide batch slabs: never materialise a (TS, B*D) pe broadcast,
    # and store each slab's result straight back to the output block.
    for b in range(batch):
        lo = b * d_model
        y = x_ref[:, lo:lo + d_model] + pe                 # (TS, D)

        if do_dropout:
            if use_hw_prng:
                raw = pltpu.prng_random_bits(y.shape)      # fresh bits per slab
                bits = pltpu.bitcast(raw, jnp.uint32)
            else:
                # Portable counter-hash fallback: global element id mixed with
                # the seed; scalar parts folded once, 2 mix rounds (hash quality
                # is ample for dropout).
                base = (pl.program_id(0) * tile_rows * n_cols + lo
                        + seed_ref[0] * jnp.int32(-1640531527))   # 0x9E3779B9
                rows = lax.broadcasted_iota(jnp.int32, y.shape, 0) * n_cols
                cols = lax.broadcasted_iota(jnp.int32, y.shape, 1)
                h = pltpu.bitcast(rows + cols + base, jnp.uint32)
                h = h * jnp.uint32(0x7FEB352D)
                h = h ^ (h >> 15)
                h = h * jnp.uint32(0x846CA68B)
                h = h ^ (h >> 16)
                bits = h
            keep = bits >= threshold                       # P(keep) = 1 - p
            y = jnp.where(keep, y * inv_keep, jnp.zeros_like(y))

        o_ref[:, lo:lo + d_model] = y.astype(o_ref.dtype)


class PositionalEncoding:
    """JAX/Pallas port of the PyTorch PositionalEncoding module (forward pass)."""

    def __init__(self, d_model, dropout=0.1, max_len=5000, use_hw_prng=True):
        assert 0.0 <= dropout < 1.0, "dropout must be in [0, 1)"
        self.p = float(dropout)
        self.d_model = int(d_model)
        self.use_hw_prng = bool(use_hw_prng)
        self._vmem_limit = self._default_vmem_limit()

        position = jnp.arange(max_len, dtype=jnp.float32)[:, None]            # (L, 1)
        div_term = jnp.exp(
            jnp.arange(0, d_model, 2, dtype=jnp.float32)
            * (-math.log(10000.0) / d_model)
        )                                                                      # (ceil(D/2),)
        angles = position * div_term                                           # (L, ceil(D/2))
        pe = jnp.zeros((max_len, d_model), dtype=jnp.float32)
        pe = pe.at[:, 0::2].set(jnp.sin(angles))
        pe = pe.at[:, 1::2].set(jnp.cos(angles)[:, : d_model // 2])
        self.pe = pe                                       # (max_len, d_model)

    @staticmethod
    def _default_vmem_limit():
        """Half of physical VMEM: 64 MiB on v5e/v6e, 32 MiB on v7x."""
        try:
            phys = int(getattr(pltpu.get_tpu_info(), "vmem_capacity_bytes", 0))
        except Exception:
            phys = 0
        if phys <= 0:
            phys = 64 << 20                                # conservative (v7x) fallback
        return int(min(64 << 20, phys // 2))

    @staticmethod
    def _pick_tile_rows(seq_len, row_bytes, itemsize, target_bytes=4 << 20):
        """Sequence-tile rows: ~target_bytes per x block, sublane-aligned, even tiles."""
        sub = {4: 8, 2: 16, 1: 32}.get(int(itemsize), 8)   # dtype-aware sublane multiple
        ts = max(sub, (target_bytes // max(int(row_bytes), 1)) // sub * sub)
        if ts >= seq_len:
            # Whole sequence fits one tile; split in two (when it stays
            # sublane-aligned) so v7x's two TensorCores both get a tile.
            if seq_len >= 4 * sub and seq_len % (2 * sub) == 0:
                return int(seq_len // 2)
            return int(seq_len)
        # Even out tiles so the last grid step isn't a ragged, masked tile.
        n_tiles = pl.cdiv(seq_len, ts)
        ts = pl.cdiv(pl.cdiv(seq_len, n_tiles), sub) * sub
        return int(ts)

    def _run(self, seed_arr, x2, pe_slice, *, S, D, n_cols, ts, B, training, use_hw_prng):
        kernel = functools.partial(
            _pos_enc_kernel,
            batch=B, d_model=D, n_cols=n_cols, tile_rows=ts,
            p=self.p, training=bool(training), use_hw_prng=use_hw_prng,
        )
        return pl.pallas_call(
            kernel,
            out_shape=jax.ShapeDtypeStruct((S, n_cols), x2.dtype),
            grid_spec=pltpu.PrefetchScalarGridSpec(
                num_scalar_prefetch=1,                     # dropout seed lives in SMEM
                grid=(pl.cdiv(S, ts),),
                in_specs=[
                    pl.BlockSpec((ts, n_cols), lambda i, seed: (i, 0)),
                    pl.BlockSpec((ts, D), lambda i, seed: (i, 0)),
                ],
                out_specs=pl.BlockSpec((ts, n_cols), lambda i, seed: (i, 0)),
            ),
            compiler_params=pltpu.CompilerParams(
                # No cross-step carry: sequence tiles shard over v7x's 2 TensorCores.
                dimension_semantics=("parallel",),
                vmem_limit_bytes=self._vmem_limit,
            ),
        )(seed_arr, x2, pe_slice)

    def __call__(self, x, *, seed=0, training=False):
        S, B, D = x.shape
        assert D == self.d_model

        n_cols = B * D
        # Free reshape of a contiguous (S, B, D) tensor: sequence rows land on
        # sublanes and B*D on lanes -> dense vregs / mostly unmasked stores.
        # TODO(synk): add a lane-axis grid dimension (or pad B*D to a multiple of
        # 128) when B*D is not lane-aligned or a single 8-row slab exceeds VMEM.
        x2 = x.reshape(S, n_cols)
        pe_slice = self.pe[:S].astype(x.dtype)             # bf16 math on v6e/v7x
        seed_arr = jnp.asarray([seed], dtype=jnp.int32)

        itemsize = jnp.dtype(x.dtype).itemsize
        ts = self._pick_tile_rows(S, n_cols * itemsize, itemsize)

        kwargs = dict(S=S, D=D, n_cols=n_cols, ts=ts, B=B, training=training)
        try:
            y2 = self._run(seed_arr, x2, pe_slice, use_hw_prng=self.use_hw_prng, **kwargs)
        except Exception:
            if not (training and self.p > 0.0 and self.use_hw_prng):
                raise
            # HW PRNG could not be lowered on this backend: fall back to the
            # portable counter-hash dropout (same semantics, more VALU work).
            self.use_hw_prng = False
            y2 = self._run(seed_arr, x2, pe_slice, use_hw_prng=False, **kwargs)

        return y2.reshape(S, B, D)


if __name__ == "__main__":
    seq_len, batch, d_model = 8, 2, 32

    key = jax.random.PRNGKey(0)
    x = jax.random.normal(key, (seq_len, batch, d_model), dtype=jnp.float32)

    mod = PositionalEncoding(d_model, dropout=0.1, max_len=5000)

    # Eval-mode forward (dropout = identity); check against a plain-JAX reference.
    y_eval = jax.block_until_ready(mod(x, training=False))
    ref = x + mod.pe[:seq_len][:, None, :]
    assert y_eval.shape == x.shape and y_eval.dtype == x.dtype
    assert jnp.allclose(y_eval, ref, atol=1e-6), "eval-mode mismatch"

    # Training-mode forward exercises the dropout path (HW PRNG by default).
    y_train = jax.block_until_ready(mod(x, seed=42, training=True))
    assert y_train.shape == x.shape and y_train.dtype == x.dtype
    scale = 1.0 / (1.0 - mod.p)
    dropped = y_train == 0.0
    kept_ok = jnp.abs(y_train - ref * scale) < 1e-4
    assert bool(jnp.all(dropped | kept_ok)), "training-mode kept values mismatch"
    n_drop = int(jnp.sum(dropped))
    assert 0 < n_drop < 0.5 * y_train.size, "dropout rate looks wrong"

    print("KERNEL_OK")
</pallas_src>

<mosaic_0001>
module attributes {stable_mosaic.version = 11 : i64} {
  func.func @_pos_enc_kernel(%arg0: i32, %arg1: memref<1xi32, #tpu.memory_space<smem>>, %arg2: memref<8x64xf32, #tpu.memory_space<vmem>>, %arg3: memref<8x32xf32, #tpu.memory_space<vmem>>, %arg4: memref<8x64xf32, #tpu.memory_space<vmem>>) attributes {dimension_semantics = [#tpu.dimension_semantics<parallel>], iteration_bounds = array<i64: 1>, scalar_prefetch = 1 : i64, scratch_operands = 0 : i64, tpu.core_type = #tpu.core_type<tc>, window_params = [{transform_indices = @transform_0, window_bounds = array<i64: 8, 64>}, {transform_indices = @transform_1, window_bounds = array<i64: 8, 32>}, {transform_indices = @transform_2, window_bounds = array<i64: 8, 64>}]} {
    %c0 = arith.constant 0 : index
    %c0_0 = arith.constant 0 : index
    %0 = vector.load %arg3[%c0, %c0_0] : memref<8x32xf32, #tpu.memory_space<vmem>>, vector<8x32xf32>
    %c0_1 = arith.constant 0 : index
    %c0_2 = arith.constant 0 : index
    %1 = vector.load %arg2[%c0_1, %c0_2] : memref<8x64xf32, #tpu.memory_space<vmem>>, vector<8x32xf32>
    %2 = arith.addf %1, %0 : vector<8x32xf32>
    %c0_3 = arith.constant 0 : index
    %c0_4 = arith.constant 0 : index
    %3 = vector.load %arg4[%c0_3, %c0_4] : memref<8x64xf32, #tpu.memory_space<vmem>>, vector<8x32xf32>
    tpu.vector_store %arg4[%c0_3, %c0_4], %2 {strides = array<i32>} : memref<8x64xf32, #tpu.memory_space<vmem>>, vector<8x32xf32>,
    %c0_5 = arith.constant 0 : index
    %c32 = arith.constant 32 : index
    %4 = vector.load %arg2[%c0_5, %c32] : memref<8x64xf32, #tpu.memory_space<vmem>>, vector<8x32xf32>
    %5 = arith.addf %4, %0 : vector<8x32xf32>
    %c0_6 = arith.constant 0 : index
    %c32_7 = arith.constant 32 : index
    %6 = vector.load %arg4[%c0_6, %c32_7] : memref<8x64xf32, #tpu.memory_space<vmem>>, vector<8x32xf32>
    tpu.vector_store %arg4[%c0_6, %c32_7], %5 {strides = array<i32>} : memref<8x64xf32, #tpu.memory_space<vmem>>, vector<8x32xf32>,
    return
  }
  func.func @transform_0(%arg0: i32, %arg1: memref<1xi32, #tpu.memory_space<smem>>) -> (i32, i32) {
    %c0_i32 = arith.constant 0 : i32
    %c0_i32_0 = arith.constant 0 : i32
    return %arg0, %c0_i32 : i32, i32
  }
  func.func @transform_1(%arg0: i32, %arg1: memref<1xi32, #tpu.memory_space<smem>>) -> (i32, i32) {
    %c0_i32 = arith.constant 0 : i32
    %c0_i32_0 = arith.constant 0 : i32
    return %arg0, %c0_i32 : i32, i32
  }
  func.func @transform_2(%arg0: i32, %arg1: memref<1xi32, #tpu.memory_space<smem>>) -> (i32, i32) {
    %c0_i32 = arith.constant 0 : i32
    %c0_i32_0 = arith.constant 0 : i32
    return %arg0, %c0_i32 : i32, i32
  }
}

</mosaic_0001>

<bundles_post_ra>
// kernel: tpu_custom_call.1
= control target key start
LH: loop header
LB: loop body
LE: loop exit
PB: predicated region body
PF: predicated region fallthrough
CT: control target
= control target key end

     0   :  { %9 = vsyncpa [#allocation5], 0  ;;  %s203_s0 = inlined_call_operand.<no memory space> [shape: s32[1], index: 0, kind: input, shape index: {}]   ;;  %s204_s1 = inlined_call_operand.hbm [shape: f32[8,64], index: 1, kind: input, shape index: {}]   ;;  %s205_s2 = inlined_call_operand.hbm [shape: f32[8,32], index: 2, kind: input, shape index: {}]   ;;  %s206_s3 = inlined_call_operand.hbm [shape: f32[8,64], index: 3, kind: output, shape index: {}]  }
   0x1   :  { %10 = vsyncpa [#allocation8], 0 }
   0x2   :  { %11 = vsyncpa [#allocation6], 0  ;;  %s143_s12 = smov [#allocation4]   ;;  %s144_s14 = smov [#allocation7]  }
   0x3   :  { %s18_s13 = sshll.u32 %s143_s12, 4  ;;  %s28_s15 = sshll.u32 %s144_s14, 4  ;;  %s19_s13 = int_to_ptr.vmem [resolvable:$true] %s18_s13  ;;  %s29_s15 = int_to_ptr.vmem [resolvable:$true] %s28_s15 }
   0x4   :  { %s71_s17 = scalar_lea.hbm %s204_s1, 128 }
   0x5   :  { %p72_p0 = scmp.ne.s32.totalorder %s204_s1, %s71_s17  ;;  %p75_p1 = scmp.lt.u32.totalorder %s71_s17, %s204_s1 }
   0x7   :  { %p77_p2 = pnand %p75_p1, %p72_p0 }
   0x9   :  { %80 = shalt.err (!%p77_p2)
}
   0xa   :  { %s81_s22 = scalar_lea.vmem %s19_s13, 128  ;;  %p86_p4 = scmp.lt.s32.totalorder %s19_s13, %s19_s13 }
   0xb   :  { %p82_p3 = scmp.ne.s32.totalorder %s19_s13, %s81_s22  ;;  %p87_p5 = scmp.lt.s32.totalorder %s81_s22, %s81_s22 }
   0xd   :  { %p88_p6 = por %p87_p5, %p86_p4 }
   0xf   :  { %p89_p7 = pnand %p88_p6, %p82_p3 }
  0x11   :  { %92 = shalt.err (!%p89_p7)
}
  0x12   :  { %21 = dma.hbm_to_vmem [thread:$0]  %s204_s1, 128, %s19_s13, [#allocation5]  }
  0x13   :  { %s93_s27 = scalar_lea.hbm %s205_s2, 128 }
  0x14   :  { %p94_p8 = scmp.ne.s32.totalorder %s205_s2, %s93_s27  ;;  %p97_p9 = scmp.lt.u32.totalorder %s93_s27, %s205_s2 }
  0x16   :  { %p99_p10 = pnand %p97_p9, %p94_p8 }
  0x18   :  { %102 = shalt.err (!%p99_p10)
}
  0x19   :  { %s103_s5 = scalar_lea.vmem %s29_s15, 128  ;;  %p108_p12 = scmp.lt.s32.totalorder %s29_s15, %s29_s15 }
  0x1a   :  { %p104_p11 = scmp.ne.s32.totalorder %s29_s15, %s103_s5  ;;  %p109_p13 = scmp.lt.s32.totalorder %s103_s5, %s103_s5 }
  0x1c   :  { %p110_p0 = por %p109_p13, %p108_p12 }
  0x1e   :  { %p111_p1 = pnand %p110_p0, %p104_p11 }
  0x20   :  { %114 = shalt.err (!%p111_p1)
}
  0x21   :  { %31 = dma.hbm_to_vmem [thread:$0]  %s205_s2, 128, %s29_s15, [#allocation8]  }
  0x22   :  { %137 = dma.done.wait [#allocation5], 128  }
  0x23   :  { %138 = vsyncadd [#allocation5], 4294967168 }
  0x24   :  { %139 = dma.done.wait [#allocation8], 128  }
  0x25   :  { %140 = vsyncadd [#allocation8], 4294967168  ;;  %v38_v0 = vld [vmem:[#allocation7] sm:$0xff]  ;;  %v39_v1 = vld [vmem:[#allocation4] sm:$0xff]  ;;  %vm41_vm0 = vcmask 261120   ;;  %s145_s7 = smov 32  }
  0x26   :  { %v40_v2 = vadd.f32 %v39_v1, %v38_v0  ;;  %45 = vrot.lane.b32.xlu0 %v38_v0, %s145_s7  ;;  %s146_s8 = smov [#allocation9]   ;;  %vm49_vm1 = vcmask 523520  }
  0x27   :  { %s57_s9 = sshll.u32 %s146_s8, 4  ;;  %s58_s9 = int_to_ptr.vmem [resolvable:$true] %s57_s9 }
  0x28   :  { %42 = vst.msk [vmem:[#allocation9] sm:$0xff] %vm41_vm0, %v40_v2  ;;  %s115_s10 = scalar_lea.vmem %s58_s9, 128  ;;  %p120_p3 = scmp.lt.s32.totalorder %s58_s9, %s58_s9 }
  0x29   :  { %p116_p2 = scmp.ne.s32.totalorder %s58_s9, %s115_s10  ;;  %p121_p4 = scmp.lt.s32.totalorder %s115_s10, %s115_s10 }
  0x2b   :  { %p122_p5 = por %p121_p4, %p120_p3 }
  0x2d   :  { %p123_p6 = pnand %p122_p5, %p116_p2 }
  0x98   :  { %v46_v3 = vpop.permute.xlu0 %45 }
  0x99   :  { %v48_v4 = vadd.f32 %v46_v3, %v39_v1 }
  0x9b   :  { %50 = vst.msk [vmem:[#allocation9] sm:$0xff] %vm49_vm1, %v48_v4 }
  0x9c   :  { %126 = shalt.err (!%p123_p6)
}
  0x9d   :  { %s127_s12 = scalar_lea.hbm %s206_s3, 128 }
  0x9e   :  { %p128_p7 = scmp.ne.s32.totalorder %s206_s3, %s127_s12  ;;  %p131_p8 = scmp.lt.u32.totalorder %s127_s12, %s206_s3 }
  0xa0   :  { %p133_p9 = pnand %p131_p8, %p128_p7 }
  0xa2   :  { %136 = shalt.err (!%p133_p9)
}
  0xa3   :  { %60 = dma.vmem_to_hbm [thread:$0]  %s58_s9, 128, %s206_s3, [#allocation6]  }
  0xa4   :  { %141 = dma.done.wait [#allocation6], 128  }
  0xa5   :  { %142 = vsyncadd [#allocation6], 4294967168 }
  0xa6   :  { %64 = vsyncpa [#allocation5], 1 }
  0xa7   :  { %65 = vsyncpa [#allocation8], 1 }
  0xa8   :  { %66 = vsyncpa [#allocation6], 1 }

</bundles_post_ra>
